<compile_context>
chip_gen: v5e
topology: v5e:2x2
jax: 0.10.0
libtpu: 0.0.40
codegen_flags: <defaults>
</compile_context>

<pallas_src>
import jax
import jax.numpy as jnp
from jax import lax
from jax.experimental import pallas as pl
from jax.experimental.pallas import tpu as pltpu


def _round_up(v, m):
    return (v + m - 1) // m * m


# ----------------------------- kernels ---------------------------------------

def _linear_kernel_accum_out(x_ref, w_ref, b_ref, o_ref):
    """f32-output variant: accumulate straight into the resident output tile.

    x_ref: (tm, tk)   w_ref: (tk, tn)   b_ref: (1, tn) f32   o_ref: (tm, tn) f32
    The output block index (i, j) is constant across the K grid axis, so o_ref
    stays resident in VMEM and doubles as the accumulator (no scratch, no
    epilogue VMEM->VMEM copy).
    """
    k = pl.program_id(2)

    @pl.when(k == 0)
    def _init():
        o_ref[...] = jnp.zeros_like(o_ref)

    # Canonical (M,K)x(K,N) MXU feed; weight was transposed once outside.
    o_ref[...] += jnp.dot(x_ref[...], w_ref[...],
                          preferred_element_type=jnp.float32)

    @pl.when(k == pl.num_programs(2) - 1)
    def _finalize():
        o_ref[...] += b_ref[...]        # bias added once, in f32


def _linear_kernel_scratch(x_ref, w_ref, b_ref, o_ref, acc_ref):
    """General variant for non-f32 outputs: f32 VMEM accumulator + final cast."""
    k = pl.program_id(2)

    @pl.when(k == 0)
    def _init():
        acc_ref[...] = jnp.zeros_like(acc_ref)

    acc_ref[...] += jnp.dot(x_ref[...], w_ref[...],
                            preferred_element_type=jnp.float32)

    @pl.when(k == pl.num_programs(2) - 1)
    def _finalize():
        o_ref[...] = (acc_ref[...] + b_ref[...]).astype(o_ref.dtype)


# ----------------------------- wrapper ----------------------------------------

def _pick_tiles(B, N, K):
    # Sublane-aligned M (multiple of 16 also matches bf16 packing); lane-dense
    # N/K.  256-multiples feed the 2x256x256 MXUs on v6e/v7x; 128 still divides
    # cleanly into v5e's 4x128x128 MXU.
    tm = min(_round_up(B, 16), 512)
    tn = 128 if N <= 128 else min(_round_up(N, 256), 512)
    tk = 128 if K <= 128 else min(_round_up(K, 256), 1024)
    # v7x megacore: make sure the ('parallel','parallel') grid extent is >= 2
    # so the second TensorCore is not idle (harmless on single-TC v5e/v6e).
    for _ in range(4):
        if (_round_up(B, tm) // tm) * (_round_up(N, tn) // tn) >= 2:
            break
        if tm >= 32:
            tm //= 2
        elif tn >= 256:
            tn //= 2
        else:
            break
    return tm, tn, tk


def linear_forward(x, weight, bias, *, tm=None, tn=None, tk=None,
                   compute_dtype=None, force_kernel=False):
    """x: (B, K), weight: (N, K), bias: (N,).  Returns (B, N, 1).

    compute_dtype: optional lower-precision MXU operand dtype (e.g.
    jnp.bfloat16); accumulation and the bias/epilogue stay float32.
    """
    B, K = x.shape
    N, Kw = weight.shape
    assert Kw == K and bias.shape == (N,)
    out_dtype = x.dtype

    # ---- tiny / padding-dominated fast path: plain XLA dot fuses with
    # neighbors and beats any kernel launch at these sizes. -------------------
    if not force_kernel:
        work = B * N * K
        padded = _round_up(B, 8) * _round_up(N, 128) * _round_up(K, 128)
        if work < (1 << 18) or padded > 8 * max(work, 1):
            return (jnp.dot(x, weight.T) + bias)[..., None]

    # ---- tile selection ------------------------------------------------------
    dtm, dtn, dtk = _pick_tiles(B, N, K)
    tm = tm if tm is not None else dtm
    tn = tn if tn is not None else dtn
    tk = tk if tk is not None else dtk

    Mp, Np, Kp = _round_up(B, tm), _round_up(N, tn), _round_up(K, tk)

    # ---- pad to tile-aligned shapes; weight goes to (K, N) layout so the MXU
    # sees a zero-copy (M,K)x(K,N) contraction (weights are static -- in a real
    # model this transpose is cached at init). --------------------------------
    x_p = x if (Mp == B and Kp == K) else jnp.pad(x, ((0, Mp - B), (0, Kp - K)))
    w_t = weight.T                                            # (K, N)
    w_p = w_t if (Kp == K and Np == N) else jnp.pad(
        w_t, ((0, Kp - K), (0, Np - N)))
    b_p = (bias if Np == N else jnp.pad(bias, (0, Np - N))).reshape(1, Np)
    b_p = b_p.astype(jnp.float32)

    if compute_dtype is not None and x_p.dtype != jnp.dtype(compute_dtype):
        x_p = x_p.astype(compute_dtype)
        w_p = w_p.astype(compute_dtype)

    grid = (Mp // tm, Np // tn, Kp // tk)

    # ---- kernel variant + VMEM budget ---------------------------------------
    use_scratch = jnp.dtype(out_dtype) != jnp.dtype(jnp.float32)
    kernel = _linear_kernel_scratch if use_scratch else _linear_kernel_accum_out
    scratch_shapes = [pltpu.VMEM((tm, tn), jnp.float32)] if use_scratch else []

    in_elt = jnp.dtype(x_p.dtype).itemsize
    out_elt = jnp.dtype(out_dtype).itemsize
    working_set = (2 * (tm * tk + tk * tn) * in_elt      # double-buffered inputs
                   + 2 * tn * 4                          # double-buffered bias
                   + 2 * tm * tn * out_elt)              # double-buffered output
    if use_scratch:
        working_set += tm * tn * 4
    # Enough headroom for the pipeline, but stay within v7x's 64 MiB physical.
    vmem_limit = int(min(max(2 * working_set + (4 << 20), 32 << 20), 64 << 20))

    out = pl.pallas_call(
        kernel,
        out_shape=jax.ShapeDtypeStruct((Mp, Np), out_dtype),
        grid_spec=pltpu.PrefetchScalarGridSpec(
            num_scalar_prefetch=0,
            grid=grid,
            in_specs=[
                pl.BlockSpec((tm, tk), lambda i, j, k: (i, k)),   # x
                pl.BlockSpec((tk, tn), lambda i, j, k: (k, j)),   # weight (K,N)
                pl.BlockSpec((1, tn), lambda i, j, k: (0, j)),    # bias
            ],
            out_specs=pl.BlockSpec((tm, tn), lambda i, j, k: (i, j)),
            scratch_shapes=scratch_shapes,
        ),
        compiler_params=pltpu.CompilerParams(
            dimension_semantics=("parallel", "parallel", "arbitrary"),
            vmem_limit_bytes=vmem_limit),
        cost_estimate=pl.CostEstimate(
            flops=2 * Mp * Np * Kp,
            transcendentals=0,
            # Real streamed traffic: x re-read per N tile, w re-read per M tile.
            bytes_accessed=(Mp * Kp * (Np // tn) * in_elt
                            + Kp * Np * (Mp // tm) * in_elt
                            + Mp * Np * out_elt
                            + Np * 4 * (Mp // tm))),
    )(x_p, w_p, b_p)

    # Drop padding, then unsqueeze(-1).
    return out[:B, :N].reshape(B, N, 1)


def init_linear_params(key, lag=6, stops=1):
    """Deterministic init mimicking torch.nn.Linear (uniform +/- 1/sqrt(fan_in))."""
    in_features = lag * stops
    out_features = stops
    kw, kb = jax.random.split(key)
    bound = 1.0 / jnp.sqrt(jnp.array(in_features, jnp.float32))
    weight = jax.random.uniform(
        kw, (out_features, in_features), jnp.float32, -bound, bound)
    bias = jax.random.uniform(
        kb, (out_features,), jnp.float32, -bound, bound)
    return weight, bias


if __name__ == "__main__":
    key = jax.random.PRNGKey(0)
    k_in, k_param, k_x2, k_w2, k_b2 = jax.random.split(key, 5)

    # --- 1) Module's native shapes: lag=6, stops=1, batch=8 (fast path) ------
    lag, stops, batch = 6, 1, 8
    x = jax.random.normal(k_in, (batch, lag * stops), jnp.float32)
    weight, bias = init_linear_params(k_param, lag=lag, stops=stops)

    out = jax.block_until_ready(linear_forward(x, weight, bias))
    ref = (x @ weight.T + bias)[..., None]
    assert out.shape == (batch, stops, 1), out.shape
    assert jnp.allclose(out, ref, atol=1e-5, rtol=1e-5)

    # --- 2) Multi-tile shapes exercising the Pallas (M,N,K) grid (f32) -------
    B2, K2, N2 = 256, 512, 256
    x2 = jax.random.normal(k_x2, (B2, K2), jnp.float32)
    w2 = jax.random.normal(k_w2, (N2, K2), jnp.float32) * 0.05
    b2 = jax.random.normal(k_b2, (N2,), jnp.float32)
    ref2 = (jnp.dot(x2, w2.T, precision=lax.Precision.HIGHEST) + b2)[..., None]

    out2 = jax.block_until_ready(
        linear_forward(x2, w2, b2, tm=128, tn=128, tk=256,   # grid (2, 2, 2)
                       force_kernel=True))
    assert out2.shape == (B2, N2, 1), out2.shape
    assert jnp.allclose(out2, ref2, atol=1e-3, rtol=1e-3)

    # --- 3) Same problem through the bf16-operand / f32-accumulate path ------
    out3 = jax.block_until_ready(
        linear_forward(x2, w2, b2, compute_dtype=jnp.bfloat16,
                       force_kernel=True))
    assert out3.shape == (B2, N2, 1), out3.shape
    assert jnp.allclose(out3, ref2, atol=1e-1, rtol=5e-2)

    # TODO(synk): params() (loss/optimizer/scheduler) and format_batch() are
    # training/data utilities with no forward-pass Pallas equivalent.
    print("KERNEL_OK")
</pallas_src>

<mosaic_0001>
module attributes {stable_mosaic.version = 11 : i64} {
  func.func @_linear_kernel_accum_out(%arg0: i32, %arg1: i32, %arg2: i32, %arg3: memref<128x256xf32, #tpu.memory_space<vmem>>, %arg4: memref<256x128xf32, #tpu.memory_space<vmem>>, %arg5: memref<1x128xf32, #tpu.memory_space<vmem>>, %arg6: memref<128x128xf32, #tpu.memory_space<vmem>>) attributes {dimension_semantics = [#tpu.dimension_semantics<parallel>, #tpu.dimension_semantics<parallel>, #tpu.dimension_semantics<arbitrary>], iteration_bounds = array<i64: 2, 2, 2>, scalar_prefetch = 0 : i64, scratch_operands = 0 : i64, tpu.core_type = #tpu.core_type<tc>, window_params = [{transform_indices = @transform_0, window_bounds = array<i64: 128, 256>}, {transform_indices = @transform_1, window_bounds = array<i64: 256, 128>}, {transform_indices = @transform_2, window_bounds = array<i64: 1, 128>}, {transform_indices = @transform_3, window_bounds = array<i64: 128, 128>}]} {
    %c0_i32 = arith.constant 0 : i32
    %0 = arith.cmpi eq, %arg2, %c0_i32 : i32
    %1 = arith.extui %0 : i1 to i32
    %c0_i32_0 = arith.constant 0 : i32
    %2 = arith.cmpi ne, %1, %c0_i32_0 : i32
    scf.if %2 {
      %cst_9 = arith.constant 0.000000e+00 : f32
      %12 = vector.broadcast %cst_9 : f32 to vector<128x128xf32>
      %c0_10 = arith.constant 0 : index
      %c0_11 = arith.constant 0 : index
      %13 = vector.load %arg6[%c0_10, %c0_11] : memref<128x128xf32, #tpu.memory_space<vmem>>, vector<128x128xf32>
      tpu.vector_store %arg6[%c0_10, %c0_11], %12 {strides = array<i32>} : memref<128x128xf32, #tpu.memory_space<vmem>>, vector<128x128xf32>,
    } else {
    }
    %c0 = arith.constant 0 : index
    %c0_1 = arith.constant 0 : index
    %3 = vector.load %arg6[%c0, %c0_1] : memref<128x128xf32, #tpu.memory_space<vmem>>, vector<128x128xf32>
    %c0_2 = arith.constant 0 : index
    %c0_3 = arith.constant 0 : index
    %4 = vector.load %arg3[%c0_2, %c0_3] : memref<128x256xf32, #tpu.memory_space<vmem>>, vector<128x256xf32>
    %c0_4 = arith.constant 0 : index
    %c0_5 = arith.constant 0 : index
    %5 = vector.load %arg4[%c0_4, %c0_5] : memref<256x128xf32, #tpu.memory_space<vmem>>, vector<256x128xf32>
    %cst = arith.constant dense<0.000000e+00> : vector<128x128xf32>
    %6 = tpu.matmul %4, %5, %cst {dimension_numbers = #tpu.dot_dimension_numbers<[1], [0], [0], [1], [0, 0, 1, 1], [], []>} : vector<128x256xf32>, vector<256x128xf32>, vector<128x128xf32> -> vector<128x128xf32>
    %7 = arith.addf %3, %6 : vector<128x128xf32>
    %c0_6 = arith.constant 0 : index
    %c0_7 = arith.constant 0 : index
    %8 = vector.load %arg6[%c0_6, %c0_7] : memref<128x128xf32, #tpu.memory_space<vmem>>, vector<128x128xf32>
    tpu.vector_store %arg6[%c0_6, %c0_7], %7 {strides = array<i32>} : memref<128x128xf32, #tpu.memory_space<vmem>>, vector<128x128xf32>,
    %c1_i32 = arith.constant 1 : i32
    %9 = arith.cmpi eq, %arg2, %c1_i32 : i32
    %10 = arith.extui %9 : i1 to i32
    %c0_i32_8 = arith.constant 0 : i32
    %11 = arith.cmpi ne, %10, %c0_i32_8 : i32
    scf.if %11 {
      %c0_9 = arith.constant 0 : index
      %c0_10 = arith.constant 0 : index
      %12 = vector.load %arg6[%c0_9, %c0_10] : memref<128x128xf32, #tpu.memory_space<vmem>>, vector<128x128xf32>
      %c0_11 = arith.constant 0 : index
      %c0_12 = arith.constant 0 : index
      %13 = vector.load %arg5[%c0_11, %c0_12] : memref<1x128xf32, #tpu.memory_space<vmem>>, vector<1x128xf32>
      %14 = vector.broadcast %13 : vector<1x128xf32> to vector<128x128xf32>
      %15 = arith.addf %12, %14 : vector<128x128xf32>
      %c0_13 = arith.constant 0 : index
      %c0_14 = arith.constant 0 : index
      %16 = vector.load %arg6[%c0_13, %c0_14] : memref<128x128xf32, #tpu.memory_space<vmem>>, vector<128x128xf32>
      tpu.vector_store %arg6[%c0_13, %c0_14], %15 {strides = array<i32>} : memref<128x128xf32, #tpu.memory_space<vmem>>, vector<128x128xf32>,
    } else {
    }
    return
  }
  func.func @transform_0(%arg0: i32, %arg1: i32, %arg2: i32) -> (i32, i32) {
    %c0_i32 = arith.constant 0 : i32
    return %arg0, %arg2 : i32, i32
  }
  func.func @transform_1(%arg0: i32, %arg1: i32, %arg2: i32) -> (i32, i32) {
    %c0_i32 = arith.constant 0 : i32
    return %arg2, %arg1 : i32, i32
  }
  func.func @transform_2(%arg0: i32, %arg1: i32, %arg2: i32) -> (i32, i32) {
    %c0_i32 = arith.constant 0 : i32
    %c0_i32_0 = arith.constant 0 : i32
    return %c0_i32, %arg1 : i32, i32
  }
  func.func @transform_3(%arg0: i32, %arg1: i32, %arg2: i32) -> (i32, i32) {
    %c0_i32 = arith.constant 0 : i32
    return %arg0, %arg1 : i32, i32
  }
}

</mosaic_0001>

<bundles_post_ra>
// kernel: tpu_custom_call.1
= control target key start
LH: loop header
LB: loop body
LE: loop exit
PB: predicated region body
PF: predicated region fallthrough
CT: control target
= control target key end

     0   :  { %s1848_s0 = inlined_call_operand.hbm [shape: f32[256,512], index: 0, kind: input, shape index: {}]   ;;  %s1849_s1 = inlined_call_operand.hbm [shape: f32[512,256], index: 1, kind: input, shape index: {}]   ;;  %s1850_s2 = inlined_call_operand.hbm [shape: f32[1,256], index: 2, kind: input, shape index: {}]   ;;  %s1851_s3 = inlined_call_operand.hbm [shape: f32[256,256], index: 3, kind: output, shape index: {}]  }
   0x1   :  { %1864 = sst [smem:[#allocation27_spill]] %s1848_s0 }
   0x2   :  { %1865 = sst [smem:[#allocation28_spill]] %s1849_s1 }
   0x3   :  { %1866 = sst [smem:[#allocation29_spill]] %s1850_s2 }
   0x4   :  { %1867 = sst [smem:[#allocation30_spill]] %s1851_s3 }
   0x5   :  { %8 = vsyncpa [#allocation3], 0 }
   0x6   :  { %10 = vsyncpa [#allocation3 + $0x1], 0 }
   0x7   :  { %11 = vsyncpa [#allocation6], 0 }
   0x8   :  { %13 = vsyncpa [#allocation6 + $0x1], 0 }
   0x9   :  { %14 = vsyncpa [#allocation4], 0 }
   0xa   :  { %16 = vsyncpa [#allocation4 + $0x1], 0  ;;  %s1332_s12 = smov 0   ;;  %s1334_s13 = smov 0  }
   0xb   :  { %s1336_s14 = smov 0   ;;  %s1338_s15 = smov 0  }
   0xc   :  { %s1340_s16 = smov 0   ;;  %s1342_s17 = smov 0  }
   0xd   :  { %s1344_s18 = smov 0   ;;  %s1346_s19 = smov 0  }
   0xe   :  { %s1348_s20 = smov 0   ;;  %s1350_s21 = smov 0  }
   0xf   :  { %s1352_s22 = smov 0   ;;  %s1354_s23 = smov 0  }
  0x10   :  { %s1356_s24 = smov 0   ;;  %s1358_s25 = smov 0  }
  0x11   :  { %s1360_s26 = smov 0   ;;  %s1362_s27 = smov 0  }
  0x12   :  { %s1364_s28 = smov 0   ;;  %s1366_s29 = smov 0  }
  0x13   :  { %s1368_s30 = smov 0  }
  0x14 LB: > { %1868 = sst [smem:[#allocation13_spill]] %s1229_s12  ;;  %s34_s4 = sadd.s32 1, %s1289_s27  ;;  %s1301_s30 = sphi %s1368_s30, %s22_s30   ;;  %s1297_s29 = sphi %s1366_s29, %s1936_s29   ;;  %s1293_s28 = sphi %s1364_s28, %s1935_s28   ;;  %s1289_s27 = sphi %s1362_s27, %s1934_s27   ;;  %s1285_s26 = sphi %s1360_s26, %s1917_s26   ;;  %s1281_s25 = sphi %s1358_s25, %s1933_s25   ;;  %s1277_s24 = sphi %s1356_s24, %s1932_s24   ;;  %s1273_s23 = sphi %s1354_s23, %s1931_s23   ;;  %s1269_s22 = sphi %s1352_s22, %s1930_s22   ;;  %s1265_s21 = sphi %s1350_s21, %s1929_s21   ;;  %s1261_s20 = sphi %s1348_s20, %s1915_s20   ;;  %s1257_s19 = sphi %s1346_s19, %s1928_s19   ;;  %s1253_s18 = sphi %s1344_s18, %s1927_s18   ;;  %s1249_s17 = sphi %s1342_s17, %s1926_s17   ;;  %s1245_s16 = sphi %s1340_s16, %s1925_s16   ;;  %s1241_s15 = sphi %s1338_s15, %s1913_s15   ;;  %s1237_s14 = sphi %s1336_s14, %s1923_s14   ;;  %s1233_s13 = sphi %s1334_s13, %s1921_s13   ;;  %s1229_s12 = sphi %s1332_s12, %s1919_s12  }
  0x15   : > { %1869 = sst [smem:[#allocation14_spill]] %s1233_s13  ;;  %s37_s5 = sadd.s32 1, %s1293_s28 }
  0x16   : > { %1870 = sst [smem:[#allocation15_spill]] %s1241_s15  ;;  %p35_p0 = scmp.ge.s32.totalorder %s34_s4, 2 }
  0x17   : > { %1871 = sst [smem:[#allocation16_spill]] %s1245_s16  ;;  %p58_p1 = scmp.eq.s32.totalorder %s1301_s30, 0 }
  0x18   : > { %1872 = sst [smem:[#allocation17_spill]] %s1261_s20  ;;  %s78_s6 = sadd.s32 1, %s1261_s20 }
  0x19   : > { %1873 = sst [smem:[#allocation18_spill]] %s1277_s24  ;;  %p85_p2 = scmp.ne.s32.totalorder %s1261_s20, %s1257_s19 }
  0x1a   : > { %1874 = sst [smem:[#allocation19_spill]] %s1281_s25  ;;  %s1938_s4 = smov (%p35_p0, %s34_s4), 0 }
  0x1b   : > { %1875 = sst [smem:[#allocation20_spill]] %s1285_s26  ;;  %s1940_s5 = smov (!%p35_p0, %s37_s5), %s1293_s28 }
  0x1c   : > { %1876 = sst [smem:[#allocation21_spill]] %s1297_s29  ;;  %s1440_s7 = ssub.s32 %s1289_s27, %s1938_s4 }
  0x1d   : > { %1877 = sst [smem:[#allocation22_spill]] %s1938_s4  ;;  %p1444_p3 = por %p85_p2, %p58_p1 }
  0x1e   : > { %p39_p4 = scmp.ge.s32.totalorder %s1940_s5, 2  ;;  %p91_p5 = scmp.ne.s32.totalorder %s1257_s19, %s1253_s18 }
  0x1f   : > { %p1862_p6 = scmp.lt.s32.totalorder %s1301_s30, 8  ;;  %s194_s10 = sand.u32 1, %s1301_s30  }
  0x20   : > { %s1455_s9 = scalar_select %p39_p4, 0, %s1940_s5  }
  0x21   : > { %s196_s3 = sand.u32 1, %s1261_s20   ;;  %s797_s26 = sshll.u32 %s1289_s27, 6 }
  0x22   : > { %1879 = sst [smem:[#allocation23_spill]] %s1455_s9  ;;  %s1460_s11 = ssub.s32 %s1293_s28, %s1455_s9 }
  0x23   : > { %s75_s4 = sor.u32 %s1460_s11, %s1440_s7  ;;  %s780_s25 = sshll.u32 %s196_s3, 8 }
  0x24   : > { %p76_p7 = scmp.eq.s32.totalorder %s75_s4, 0  ;;  %s203_s2 = sadd.s32 %s1293_s28, %s797_s26 }
  0x25   : > { %s198_s12 = scalar_lea.vmem [#allocation5], %s780_s25  ;;  %s783_s15 = sshll.u32 %s203_s2, 3 }
  0x26   : > { %s1467_s24 = scalar_select %p76_p7, %s1261_s20, %s78_s6  }
  0x27   : > { %s208_s13 = sshll.u32 %s198_s12, 4  ;;  %s1881_s1 = sld [smem:[#allocation28_spill]]  ;;  %s209_s13 = int_to_ptr.vmem [resolvable:$true] %s208_s13 }
  0x28   : > { %1880 = sst [smem:[#allocation24_spill]] %s1467_s24  ;;  %p843_p8 = pnand %p1862_p6, %p1444_p3 }
  0x29   : > { %p784_p9 = scmp.ge.s32.totalorder %s1301_s30, 1  ;;  %s1478_s2 = scalar_lea.sflag [#allocation6], %s194_s10 }
  0x2a   : > { %s1858_s12 = smov 256   ;;  %s1304_s25 = smov 128  }
  0x2b   : > { %s1305_s16 = smov 8   ;;  %p233_p10 = scmp.lt.s32.totalorder %s1301_s30, 9 }
  0x2c   : > { %s41_s26 = sadd.s32 1, %s1297_s29  ;;  %s50_s6 = sadd.s32 1, %s1273_s23 }
  0x2d   : > { %s205_s4 = scalar_lea.hbm %s1881_s1, %s783_s15  ;;  %p1483_p11 = pnand %p784_p9, %p233_p10 }
  0x2e   : > { %s206_s3 = sshll.u32 %s205_s4, 4  ;;  %s1942_s26 = smov (!%p39_p4, %s41_s26), %s1297_s29  ;;  %s207_s3 = int_to_ptr.hbm [resolvable:$true] %s206_s3 }
  0x2f   : > { %845 = dma.hbm_to_vmem [thread:$0]  (!%p843_p8), %s207_s3, 4096, %s209_s13, %s1478_s2, %s1858_s12, %s1304_s25, %s1305_s16  }
  0x30   : > { %s1882_s15 = scalar_select %p1483_p11, 1, 0 }
  0x31   : > { %p57_p12 = scmp.ne.s32.totalorder %s1273_s23, %s1269_s22  ;;  %p63_p13 = scmp.ne.s32.totalorder %s1269_s22, %s1265_s21 }
  0x32   : > { %1883 = sst [smem:[#allocation25_spill]] %s1882_s15  ;;  %p43_p0 = scmp.ge.s32.totalorder %s1942_s26, 2 }
  0x33   : > { %s132_s8 = sadd.s32 1, %s1237_s14  ;;  %p1499_p2 = por %p58_p1, %p57_p12 }
  0x34   : > { %s169_s9 = sand.u32 1, %s1273_s23   ;;  %s1944_s26 = smov (%p43_p0, %s1942_s26), 0 }
  0x35   : > { %1885 = sst [smem:[#allocation26_spill]] %s1944_s26  ;;  %s775_s10 = sshll.u32 %s169_s9, 8 }
  0x36   : > { %s45_s5 = ssub.s32 %s1297_s29, %s1944_s26  ;;  %s777_s25 = sshll.u32 %s1289_s27, 1 }
  0x37   : > { %s47_s4 = sor.u32 %s1440_s7, %s45_s5  ;;  %s129_s3 = sor.u32 %s1460_s11, %s45_s5 }
  0x38   : > { %p48_p3 = scmp.eq.s32.totalorder %s47_s4, 0  ;;  %p130_p4 = scmp.eq.s32.totalorder %s129_s3, 0 }
  0x39   : > { %s796_s16 = sshll.u32 %s1297_s29, 6  ;;  %s173_s20 = scalar_lea.vmem [#allocation2], %s775_s10 }
  0x3a   : > { %s1513_s12 = scalar_select %p48_p3, %s1273_s23, %s50_s6  }
  0x3b   : > { %s1516_s1 = scalar_select %p130_p4, %s1237_s14, %s132_s8  }
  0x3c   : > { %s179_s24 = sadd.s32 %s796_s16, %s777_s25  ;;  %s184_s15 = sshll.u32 %s173_s20, 4  ;;  %s185_s15 = int_to_ptr.vmem [resolvable:$true] %s184_s15 }
  0x3d   : > { %s779_s26 = sshll.u32 %s179_s24, 3  ;;  %s1886_s0 = sld [smem:[#allocation27_spill]] }
  0x3e   : > { %s1887_s8 = sld [smem:[#allocation16_spill]]  ;;  %p840_p7 = pnand %p1862_p6, %p1499_p2 }
  0x3f   : > { %s1888_s4 = sld [smem:[#allocation15_spill]]  ;;  %s170_s24 = scalar_lea.sflag [#allocation3], %s169_s9 }
  0x40   : > { %s1889_s20 = sld [smem:[#allocation14_spill]]  ;;  %s1306_s3 = smov 512  }
  0x41   : > { %s1307_s25 = smov 16   ;;  %s1890_s16 = smov 256  }
  0x42   : > { %s1891_s7 = sld [smem:[#allocation13_spill]]  ;;  %s772_s13 = sadd.s32 4294967294, %s1301_s30  }
  0x43   : > { %s181_s6 = scalar_lea.hbm %s1886_s0, %s779_s26  ;;  %s1527_s26 = sadd.s32 4294967295, %s1301_s30  }
  0x44   : > { %s182_s10 = sshll.u32 %s181_s6, 4  ;;  %p64_p8 = scmp.eq.s32.totalorder %s1527_s26, 0  ;;  %s183_s10 = int_to_ptr.hbm [resolvable:$true] %s182_s10 }
  0x45   : > { %842 = dma.hbm_to_vmem [thread:$0]  (!%p840_p7), %s183_s10, 4096, %s185_s15, %s170_s24, %s1306_s3, %s1890_s16, %s1307_s25  }
  0x46   : > { %p102_p9 = scmp.eq.s32.totalorder %s1460_s11, 0  ;;  %s104_s5 = sadd.s32 1, %s1249_s17 }
  0x47   : > { %p1536_p10 = por %p64_p8, %p63_p13  ;;  %p1543_p12 = por %p91_p5, %p64_p8 }
  0x48   : > { %s1548_s6 = scalar_select %p102_p9, %s1249_s17, %s104_s5  }
  0x49   : > { %p111_p0 = scmp.ne.s32.totalorder %s1249_s17, %s1887_s8  ;;  %p117_p2 = scmp.ne.s32.totalorder %s1887_s8, %s1888_s4 }
  0x4a   : > { %p142_p3 = scmp.ne.s32.totalorder %s1237_s14, %s1889_s20  ;;  %p143_p4 = scmp.eq.s32.totalorder %s1527_s26, 7 }
  0x4b   : > { %p1559_p7 = por %p111_p0, %p58_p1  ;;  %p1563_p13 = por %p117_p2, %p64_p8 }
  0x4c   : > { %p1567_p5 = por %p143_p4, %p142_p3  ;;  %p148_p9 = scmp.ne.s32.totalorder %s1889_s20, %s1891_s7 }
  0x4d   : > { %p149_p6 = scmp.eq.s32.totalorder %s772_s13, 7  ;;  %s220_s8 = sand.u32 1, %s1249_s17  }
  0x4e   : > { %s1897_s24 = sld [smem:[#allocation29_spill]]  ;;  %s221_s5 = scalar_lea.vmem [#allocation7], %s220_s8 }
  0x4f   : > { %p1578_p1 = por %p149_p6, %p148_p9  ;;  %s228_s0 = sshll.u32 %s221_s5, 4  ;;  %s229_s0 = int_to_ptr.vmem [resolvable:$true] %s228_s0 }
  0x50   : > { %p1899_p8 = scmp.lt.s32.totalorder %s1301_s30, 8  ;;  %s239_s7 = sand.u32 (!%p1483_p11), 1, %s1269_s22  }
  0x51   : > { %s785_s13 = sshll.u32 (!%p1483_p11), %s239_s7, 8  ;;  %s240_s4 = scalar_lea.sflag (!%p1483_p11), [#allocation3], %s239_s7 }
  0x52   : > { %p846_p0 = pnand %p1899_p8, %p1559_p7  ;;  %237 = sbr.rel (%p1483_p11) target bundleno = 402 (0x192), region = 32 }
  0x53   : > { %s1590_s10 = scalar_lea.vmem (!%p1483_p11), [#allocation2], %s785_s13 }
  0x54   : > { %s224_s3 = scalar_lea.hbm %s1897_s24, %s1293_s28 }
  0x55   : > { %s226_s16 = sshll.u32 %s224_s3, 4  ;;  %s227_s16 = int_to_ptr.hbm [resolvable:$true] %s226_s16 }
  0x56   : > { %848 = dma.hbm_to_vmem [thread:$0]  (!%p846_p0), %s227_s16, 16, %s229_s0, %s1478_s2  }
  0x57   : > { %1212 = dma.done.wait (%p1536_p10), %s240_s4, 4096  }
  0x58   : > { %1214 = vsyncadd (%p1536_p10), %s240_s4, 4294963200  ;;  %s249_s21 = sand.u32 1, %s1527_s26   ;;  %s251_s0 = sand.u32 1, %s1257_s19  }
  0x59   : > { %s786_s2 = sshll.u32 %s251_s0, 8  ;;  %s250_s8 = scalar_lea.sflag [#allocation6], %s249_s21 }
  0x5a   : > { %s1598_s24 = scalar_lea.vmem [#allocation5], %s786_s2 }
  0x5b   : > { %1216 = dma.done.wait (%p1543_p12), %s250_s8, 4096  }
  0x5c   : > { %1218 = vsyncadd (%p1543_p12), %s250_s8, 4294963200  ;;  %s1901_s3 = sld [smem:[#allocation16_spill]] }
  0x62   : > { %s261_s16 = sand.u32 1, %s1901_s3  }
  0x63   : > { %s1605_s5 = scalar_lea.vmem [#allocation7], %s261_s16 }
  0x64   : > { %1220 = dma.done.wait (%p1563_p13), %s250_s8, 16  }
  0x65   : > { %1222 = vsyncadd (%p1563_p13), %s250_s8, 4294967280  ;;  %s1902_s26 = sld [smem:[#allocation14_spill]] }
  0x66   : > { %s1903_s13 = sld [smem:[#allocation18_spill]] }
  0x6b   : > { %s292_s9 = sand.u32 1, %s1902_s26  }
  0x6c   : > { %s787_s20 = sshll.u32 %s292_s9, 7  ;;  %p788_p6 = scmp.ne.s32.totalorder %s1903_s13, 0 }
  0x6d   : > { %s1614_s7 = scalar_lea.vmem [#allocation8], %s787_s20 }
  0x6e   : > { %302 = sbr.rel (%p788_p6) target bundleno = 132 (0x84), region = 48 }
  0x73   : > { %v1308_v0 = vmov 0.0  }
  0x74   : > { %303 = vst [vmem:[%s1614_s7] sm:$0xff] %v1308_v0 }
  0x75   : > { %304 = vst [vmem:[%s1614_s7 + $0x8] sm:$0xff] %v1308_v0 }
  0x76   : > { %305 = vst [vmem:[%s1614_s7 + $0x10] sm:$0xff] %v1308_v0 }
  0x77   : > { %306 = vst [vmem:[%s1614_s7 + $0x18] sm:$0xff] %v1308_v0 }
  0x78   : > { %307 = vst [vmem:[%s1614_s7 + $0x20] sm:$0xff] %v1308_v0 }
  0x79   : > { %308 = vst [vmem:[%s1614_s7 + $0x28] sm:$0xff] %v1308_v0 }
  0x7a   : > { %309 = vst [vmem:[%s1614_s7 + $0x30] sm:$0xff] %v1308_v0 }
  0x7b   : > { %310 = vst [vmem:[%s1614_s7 + $0x38] sm:$0xff] %v1308_v0 }
  0x7c   : > { %311 = vst [vmem:[%s1614_s7 + $0x40] sm:$0xff] %v1308_v0 }
  0x7d   : > { %312 = vst [vmem:[%s1614_s7 + $0x48] sm:$0xff] %v1308_v0 }
  0x7e   : > { %313 = vst [vmem:[%s1614_s7 + $0x50] sm:$0xff] %v1308_v0 }
  0x7f   : > { %314 = vst [vmem:[%s1614_s7 + $0x58] sm:$0xff] %v1308_v0 }
  0x80   : > { %315 = vst [vmem:[%s1614_s7 + $0x60] sm:$0xff] %v1308_v0 }
  0x81   : > { %316 = vst [vmem:[%s1614_s7 + $0x68] sm:$0xff] %v1308_v0 }
  0x82   : > { %317 = vst [vmem:[%s1614_s7 + $0x70] sm:$0xff] %v1308_v0 }
  0x83   : > { %318 = vst [vmem:[%s1614_s7 + $0x78] sm:$0xff] %v1308_v0 }
  0x84 PF: > { %v382_v1 = vld [vmem:[%s1598_s24 + $0x78] sm:$0xff]  ;;  %v381_v3 = vld [vmem:[%s1598_s24 + $0x70] sm:$0xff]  ;;  %v380_v5 = vld [vmem:[%s1598_s24 + $0x68] sm:$0xff]  ;;  %s1904_s15 = sld [smem:[#allocation18_spill]] }
  0x85   : > { %v398_v2 = vld [vmem:[%s1598_s24 + $0xf8] sm:$0xff]  ;;  %799 = vmatpush.msra.mxu2 %v382_v1  ;;  %v397_v4 = vld [vmem:[%s1598_s24 + $0xf0] sm:$0xff]  ;;  %v396_v6 = vld [vmem:[%s1598_s24 + $0xe8] sm:$0xff]  ;;  %399 = vmatpush.msra.mxu0 %v382_v1 }
  0x86   : > { %815 = vmatpush.msra.mxu3 %v398_v2  ;;  %464 = vmatpush.msra.mxu1 %v398_v2  ;;  %v379_v7 = vld [vmem:[%s1598_s24 + $0x60] sm:$0xff]  ;;  %v378_v9 = vld [vmem:[%s1598_s24 + $0x58] sm:$0xff]  ;;  %v377_v11 = vld [vmem:[%s1598_s24 + $0x50] sm:$0xff] }
  0x87   : > { %800 = vmatpush.msra.mxu2 %v381_v3  ;;  %v395_v8 = vld [vmem:[%s1598_s24 + $0xe0] sm:$0xff]  ;;  %400 = vmatpush.msra.mxu0 %v381_v3  ;;  %v394_v10 = vld [vmem:[%s1598_s24 + $0xd8] sm:$0xff]  ;;  %v393_v12 = vld [vmem:[%s1598_s24 + $0xd0] sm:$0xff] }
  0x88   : > { %816 = vmatpush.msra.mxu3 %v397_v4  ;;  %465 = vmatpush.msra.mxu1 %v397_v4  ;;  %v376_v13 = vld [vmem:[%s1598_s24 + $0x48] sm:$0xff]  ;;  %v375_v15 = vld [vmem:[%s1598_s24 + $0x40] sm:$0xff]  ;;  %v374_v17 = vld [vmem:[%s1598_s24 + $0x38] sm:$0xff] }
  0x89   : > { %801 = vmatpush.msra.mxu2 %v380_v5  ;;  %401 = vmatpush.msra.mxu0 %v380_v5  ;;  %v392_v14 = vld [vmem:[%s1598_s24 + $0xc8] sm:$0xff]  ;;  %v391_v16 = vld [vmem:[%s1598_s24 + $0xc0] sm:$0xff]  ;;  %v390_v18 = vld [vmem:[%s1598_s24 + $0xb8] sm:$0xff] }
  0x8a   : > { %817 = vmatpush.msra.mxu3 %v396_v6  ;;  %466 = vmatpush.msra.mxu1 %v396_v6  ;;  %v373_v19 = vld [vmem:[%s1598_s24 + $0x30] sm:$0xff]  ;;  %v372_v21 = vld [vmem:[%s1598_s24 + $0x28] sm:$0xff]  ;;  %v371_v23 = vld [vmem:[%s1598_s24 + $0x20] sm:$0xff]  ;;  %p789_p11 = scmp.ne.s32.totalorder %s1904_s15, 1 }
  0x8b   : > { %802 = vmatpush.msra.mxu2 %v379_v7  ;;  %402 = vmatpush.msra.mxu0 %v379_v7  ;;  %v389_v20 = vld [vmem:[%s1598_s24 + $0xb0] sm:$0xff]  ;;  %v388_v22 = vld [vmem:[%s1598_s24 + $0xa8] sm:$0xff]  ;;  %v387_v24 = vld [vmem:[%s1598_s24 + $0xa0] sm:$0xff] }
  0x8c   : > { %818 = vmatpush.msra.mxu3 %v395_v8  ;;  %467 = vmatpush.msra.mxu1 %v395_v8  ;;  %v370_v25 = vld [vmem:[%s1598_s24 + $0x18] sm:$0xff]  ;;  %v369_v27 = vld [vmem:[%s1598_s24 + $0x10] sm:$0xff]  ;;  %v368_v29 = vld [vmem:[%s1598_s24 + $0x8] sm:$0xff] }
  0x8d   : > { %803 = vmatpush.msra.mxu2 %v378_v9  ;;  %403 = vmatpush.msra.mxu0 %v378_v9  ;;  %v386_v26 = vld [vmem:[%s1598_s24 + $0x98] sm:$0xff]  ;;  %v385_v28 = vld [vmem:[%s1598_s24 + $0x90] sm:$0xff]  ;;  %v384_v30 = vld [vmem:[%s1598_s24 + $0x88] sm:$0xff] }
  0x8e   : > { %819 = vmatpush.msra.mxu3 %v394_v10  ;;  %468 = vmatpush.msra.mxu1 %v394_v10  ;;  %v367_v31 = vld [vmem:[%s1598_s24] sm:$0xff]  ;;  %v352_v34 = vld [vmem:[%s1590_s10 + $0x88] sm:$0xff]  ;;  %v353_v37 = vld [vmem:[%s1590_s10 + $0x90] sm:$0xff] }
  0x8f   : > { %804 = vmatpush.msra.mxu2 %v377_v11  ;;  %404 = vmatpush.msra.mxu0 %v377_v11  ;;  %v383_v32 = vld [vmem:[%s1598_s24 + $0x80] sm:$0xff]  ;;  %v336_v36 = vld [vmem:[%s1590_s10 + $0x8] sm:$0xff]  ;;  %v354_v38 = vld [vmem:[%s1590_s10 + $0x98] sm:$0xff] }
  0x90   : > { %820 = vmatpush.msra.mxu3 %v393_v12  ;;  %469 = vmatpush.msra.mxu1 %v393_v12  ;;  %v351_v33 = vld [vmem:[%s1590_s10 + $0x80] sm:$0xff]  ;;  %v337_v39 = vld [vmem:[%s1590_s10 + $0x10] sm:$0xff]  ;;  %v338_v40 = vld [vmem:[%s1590_s10 + $0x18] sm:$0xff] }
  0x91   : > { %805 = vmatpush.msra.mxu2 %v376_v13  ;;  %405 = vmatpush.msra.mxu0 %v376_v13  ;;  %v335_v35 = vld [vmem:[%s1590_s10] sm:$0xff]  ;;  %v356_v42 = vld [vmem:[%s1590_s10 + $0xa8] sm:$0xff]  ;;  %v357_v45 = vld [vmem:[%s1590_s10 + $0xb0] sm:$0xff] }
  0x92   : > { %821 = vmatpush.msra.mxu3 %v392_v14  ;;  %470 = vmatpush.msra.mxu1 %v392_v14  ;;  %v355_v41 = vld [vmem:[%s1590_s10 + $0xa0] sm:$0xff]  ;;  %v340_v44 = vld [vmem:[%s1590_s10 + $0x28] sm:$0xff]  ;;  %v358_v46 = vld [vmem:[%s1590_s10 + $0xb8] sm:$0xff] }
  0x93   : > { %806 = vmatpush.msra.mxu2 %v375_v15  ;;  %406 = vmatpush.msra.mxu0 %v375_v15  ;;  %v339_v43 = vld [vmem:[%s1590_s10 + $0x20] sm:$0xff]  ;;  %v341_v47 = vld [vmem:[%s1590_s10 + $0x30] sm:$0xff]  ;;  %v342_v48 = vld [vmem:[%s1590_s10 + $0x38] sm:$0xff] }
  0x94   : > { %822 = vmatpush.msra.mxu3 %v391_v16  ;;  %471 = vmatpush.msra.mxu1 %v391_v16  ;;  %v359_v49 = vld [vmem:[%s1590_s10 + $0xc0] sm:$0xff]  ;;  %v360_v50 = vld [vmem:[%s1590_s10 + $0xc8] sm:$0xff]  ;;  %v361_v53 = vld [vmem:[%s1590_s10 + $0xd0] sm:$0xff] }
  0x95   : > { %807 = vmatpush.msra.mxu2 %v374_v17  ;;  %407 = vmatpush.msra.mxu0 %v374_v17  ;;  %v343_v51 = vld [vmem:[%s1590_s10 + $0x40] sm:$0xff]  ;;  %v344_v52 = vld [vmem:[%s1590_s10 + $0x48] sm:$0xff]  ;;  %v362_v54 = vld [vmem:[%s1590_s10 + $0xd8] sm:$0xff] }
  0x96   : > { %823 = vmatpush.msra.mxu3 %v390_v18  ;;  %472 = vmatpush.msra.mxu1 %v390_v18  ;;  %v345_v55 = vld [vmem:[%s1590_s10 + $0x50] sm:$0xff]  ;;  %v346_v56 = vld [vmem:[%s1590_s10 + $0x58] sm:$0xff]  ;;  %v363_v57 = vld [vmem:[%s1590_s10 + $0xe0] sm:$0xff] }
  0x97   : > { %808 = vmatpush.msra.mxu2 %v373_v19  ;;  %408 = vmatpush.msra.mxu0 %v373_v19  ;;  %v364_v58 = vld [vmem:[%s1590_s10 + $0xe8] sm:$0xff]  ;;  %v347_v59 = vld [vmem:[%s1590_s10 + $0x60] sm:$0xff]  ;;  %v365_v61 = vld [vmem:[%s1590_s10 + $0xf0] sm:$0xff] }
  0x98   : > { %824 = vmatpush.msra.mxu3 %v389_v20  ;;  %473 = vmatpush.msra.mxu1 %v389_v20  ;;  %v348_v60 = vld [vmem:[%s1590_s10 + $0x68] sm:$0xff]  ;;  %v366_v62 = vld [vmem:[%s1590_s10 + $0xf8] sm:$0xff]  ;;  %v349_v63 = vld [vmem:[%s1590_s10 + $0x70] sm:$0xff] }
  0x99   : > { %809 = vmatpush.msra.mxu2 %v372_v21  ;;  %409 = vmatpush.msra.mxu0 %v372_v21  ;;  %v350_v0 = vld [vmem:[%s1590_s10 + $0x78] sm:$0xff]  ;;  %v319_v2 = vld [vmem:[%s1614_s7] sm:$0xff]  ;;  %v320_v12 = vld [vmem:[%s1614_s7 + $0x8] sm:$0xff] }
  0x9a   : > { %825 = vmatpush.msra.mxu3 %v388_v22  ;;  %474 = vmatpush.msra.mxu1 %v388_v22  ;;  %v327_v7 = vld [vmem:[%s1614_s7 + $0x40] sm:$0xff]  ;;  %v328_v17 = vld [vmem:[%s1614_s7 + $0x48] sm:$0xff]  ;;  %v321_v22 = vld [vmem:[%s1614_s7 + $0x10] sm:$0xff] }
  0x9b   : > { %810 = vmatpush.msra.mxu2 %v371_v23  ;;  %410 = vmatpush.msra.mxu0 %v371_v23 }
  0x9c   : > { %826 = vmatpush.msra.mxu3 %v387_v24  ;;  %475 = vmatpush.msra.mxu1 %v387_v24 }
  0x9d   : > { %811 = vmatpush.msra.mxu2 %v370_v25  ;;  %411 = vmatpush.msra.mxu0 %v370_v25 }
  0x9e   : > { %827 = vmatpush.msra.mxu3 %v386_v26  ;;  %476 = vmatpush.msra.mxu1 %v386_v26 }
  0x9f   : > { %812 = vmatpush.msra.mxu2 %v369_v27  ;;  %412 = vmatpush.msra.mxu0 %v369_v27  ;;  %v329_v27 = vld [vmem:[%s1614_s7 + $0x50] sm:$0xff] }
  0xa0   : > { %828 = vmatpush.msra.mxu3 %v385_v28  ;;  %477 = vmatpush.msra.mxu1 %v385_v28 }
  0xa1   : > { %813 = vmatpush.msra.mxu2 %v368_v29  ;;  %413 = vmatpush.msra.mxu0 %v368_v29 }
  0xa2   : > { %829 = vmatpush.msra.mxu3 %v384_v30  ;;  %478 = vmatpush.msra.mxu1 %v384_v30 }
  0xa3   : > { %814 = vmatpush.msra.mxu2 %v367_v31  ;;  %414 = vmatpush.msra.mxu0 %v367_v31 }
  0xa4   : > { %830 = vmatpush.msra.mxu3 %v383_v32  ;;  %439 = vmatmul.f32.vlgmr.msra.gmra.mxu2 %v351_v33 }
  0xa5   : > { %504 = vmatmul.f32.vlgmr.msra.gmra.mxu3 %v352_v34  ;;  %479 = vmatpush.msra.mxu1 %v383_v32  ;;  %v322_v32 = vld [vmem:[%s1614_s7 + $0x18] sm:$0xff] }
  0xa6   : > { %415 = vmatmul.f32.vlgmr.msra.gmra.mxu0 %v335_v35  ;;  %480 = vmatmul.f32.vlgmr.msra.gmra.mxu1 %v336_v36 }
  0xac   : > { %442 = vmatmul.f32.gmra.mxu2 %v353_v37  ;;  %v330_v37 = vld [vmem:[%s1614_s7 + $0x58] sm:$0xff] }
  0xad   : > { %507 = vmatmul.f32.gmra.mxu3 %v354_v38 }
  0xae   : > { %418 = vmatmul.f32.gmra.mxu0 %v337_v39  ;;  %483 = vmatmul.f32.gmra.mxu1 %v338_v40 }
  0xb4   : > { %445 = vmatmul.f32.gmra.mxu2 %v355_v41 }
  0xb5   : > { %510 = vmatmul.f32.gmra.mxu3 %v356_v42  ;;  %v323_v42 = vld [vmem:[%s1614_s7 + $0x20] sm:$0xff] }
  0xb6   : > { %421 = vmatmul.f32.gmra.mxu0 %v339_v43  ;;  %486 = vmatmul.f32.gmra.mxu1 %v340_v44 }
  0xbc   : > { %448 = vmatmul.f32.gmra.mxu2 %v357_v45 }
  0xbd   : > { %513 = vmatmul.f32.gmra.mxu3 %v358_v46 }
  0xbe   : > { %424 = vmatmul.f32.gmra.mxu0 %v341_v47  ;;  %489 = vmatmul.f32.gmra.mxu1 %v342_v48  ;;  %v331_v47 = vld [vmem:[%s1614_s7 + $0x60] sm:$0xff] }
  0xc4   : > { %451 = vmatmul.f32.gmra.mxu2 %v359_v49 }
  0xc5   : > { %516 = vmatmul.f32.gmra.mxu3 %v360_v50 }
  0xc6   : > { %427 = vmatmul.f32.gmra.mxu0 %v343_v51  ;;  %492 = vmatmul.f32.gmra.mxu1 %v344_v52  ;;  %v324_v52 = vld [vmem:[%s1614_s7 + $0x28] sm:$0xff] }
  0xcc   : > { %454 = vmatmul.f32.gmra.mxu2 %v361_v53 }
  0xcd   : > { %519 = vmatmul.f32.gmra.mxu3 %v362_v54 }
  0xce   : > { %430 = vmatmul.f32.gmra.mxu0 %v345_v55  ;;  %495 = vmatmul.f32.gmra.mxu1 %v346_v56 }
  0xd4   : > { %457 = vmatmul.f32.gmra.mxu2 %v363_v57  ;;  %v332_v57 = vld [vmem:[%s1614_s7 + $0x68] sm:$0xff] }
  0xd5   : > { %522 = vmatmul.f32.gmra.mxu3 %v364_v58 }
  0xd6   : > { %433 = vmatmul.f32.gmra.mxu0 %v347_v59  ;;  %498 = vmatmul.f32.gmra.mxu1 %v348_v60 }
  0xdc   : > { %460 = vmatmul.f32.gmra.mxu2 %v365_v61 }
  0xdd   : > { %525 = vmatmul.f32.gmra.mxu3 %v366_v62  ;;  %v325_v62 = vld [vmem:[%s1614_s7 + $0x30] sm:$0xff] }
  0xde   : > { %436 = vmatmul.f32.gmra.mxu0 %v349_v63  ;;  %501 = vmatmul.f32.gmra.mxu1 %v350_v0 }
 0x123   : > { %v416_v1 = vpop.f32.mrf.mxu0  ;;  %v481_v3 = vpop.f32.mrf.mxu1 }
 0x124   : > { %v482_v4 = vadd.f32 %v481_v3, %v416_v1  ;;  %v333_v3 = vld [vmem:[%s1614_s7 + $0x70] sm:$0xff] }
 0x126   : > { %v529_v5 = vadd.f32 %v482_v4, %v319_v2 }
 0x127   : > { %v440_v6 = vpop.f32.mrf.mxu2 }
 0x128   : > { %v505_v8 = vpop.f32.mrf.mxu3  ;;  %545 = vst [vmem:[%s1614_s7] sm:$0xff] %v529_v5 }
 0x129   : > { %v506_v9 = vadd.f32 %v505_v8, %v440_v6  ;;  %v326_v8 = vld [vmem:[%s1614_s7 + $0x38] sm:$0xff] }
 0x12b   : > { %v537_v10 = vadd.f32 %v506_v9, %v327_v7  ;;  %v419_v11 = vpop.f32.mrf.mxu0  ;;  %v484_v13 = vpop.f32.mrf.mxu1 }
 0x12c   : > { %v485_v14 = vadd.f32 %v484_v13, %v419_v11  ;;  %v334_v13 = vld [vmem:[%s1614_s7 + $0x78] sm:$0xff] }
 0x12d   : > { %553 = vst [vmem:[%s1614_s7 + $0x40] sm:$0xff] %v537_v10 }
 0x12e   : > { %v530_v15 = vadd.f32 %v485_v14, %v320_v12 }
 0x12f   : > { %v443_v16 = vpop.f32.mrf.mxu2 }
 0x130   : > { %v508_v18 = vpop.f32.mrf.mxu3  ;;  %546 = vst [vmem:[%s1614_s7 + $0x8] sm:$0xff] %v530_v15 }
 0x131   : > { %v509_v19 = vadd.f32 %v508_v18, %v443_v16 }
 0x133   : > { %v538_v20 = vadd.f32 %v509_v19, %v328_v17  ;;  %v422_v21 = vpop.f32.mrf.mxu0  ;;  %v487_v23 = vpop.f32.mrf.mxu1 }
 0x134   : > { %v488_v24 = vadd.f32 %v487_v23, %v422_v21 }
 0x135   : > { %554 = vst [vmem:[%s1614_s7 + $0x48] sm:$0xff] %v538_v20 }
 0x136   : > { %v531_v25 = vadd.f32 %v488_v24, %v321_v22 }
 0x137   : > { %v446_v26 = vpop.f32.mrf.mxu2 }
 0x138   : > { %v511_v28 = vpop.f32.mrf.mxu3  ;;  %547 = vst [vmem:[%s1614_s7 + $0x10] sm:$0xff] %v531_v25 }
 0x139   : > { %v512_v29 = vadd.f32 %v511_v28, %v446_v26 }
 0x13b   : > { %v539_v30 = vadd.f32 %v512_v29, %v329_v27  ;;  %v425_v31 = vpop.f32.mrf.mxu0  ;;  %v490_v33 = vpop.f32.mrf.mxu1 }
 0x13c   : > { %v491_v34 = vadd.f32 %v490_v33, %v425_v31 }
 0x13d   : > { %555 = vst [vmem:[%s1614_s7 + $0x50] sm:$0xff] %v539_v30 }
 0x13e   : > { %v532_v35 = vadd.f32 %v491_v34, %v322_v32 }
 0x13f   : > { %v449_v36 = vpop.f32.mrf.mxu2 }
 0x140   : > { %v514_v38 = vpop.f32.mrf.mxu3  ;;  %548 = vst [vmem:[%s1614_s7 + $0x18] sm:$0xff] %v532_v35 }
 0x141   : > { %v515_v39 = vadd.f32 %v514_v38, %v449_v36 }
 0x143   : > { %v540_v40 = vadd.f32 %v515_v39, %v330_v37  ;;  %v428_v41 = vpop.f32.mrf.mxu0  ;;  %v493_v43 = vpop.f32.mrf.mxu1 }
 0x144   : > { %v494_v44 = vadd.f32 %v493_v43, %v428_v41 }
 0x145   : > { %556 = vst [vmem:[%s1614_s7 + $0x58] sm:$0xff] %v540_v40 }
 0x146   : > { %v533_v45 = vadd.f32 %v494_v44, %v323_v42 }
 0x147   : > { %v452_v46 = vpop.f32.mrf.mxu2 }
 0x148   : > { %v517_v48 = vpop.f32.mrf.mxu3  ;;  %549 = vst [vmem:[%s1614_s7 + $0x20] sm:$0xff] %v533_v45 }
 0x149   : > { %v518_v49 = vadd.f32 %v517_v48, %v452_v46 }
 0x14b   : > { %v541_v50 = vadd.f32 %v518_v49, %v331_v47  ;;  %v431_v51 = vpop.f32.mrf.mxu0  ;;  %v496_v53 = vpop.f32.mrf.mxu1 }
 0x14c   : > { %v497_v54 = vadd.f32 %v496_v53, %v431_v51 }
 0x14d   : > { %557 = vst [vmem:[%s1614_s7 + $0x60] sm:$0xff] %v541_v50 }
 0x14e   : > { %v534_v55 = vadd.f32 %v497_v54, %v324_v52 }
 0x14f   : > { %v455_v56 = vpop.f32.mrf.mxu2 }
 0x150   : > { %v520_v58 = vpop.f32.mrf.mxu3  ;;  %550 = vst [vmem:[%s1614_s7 + $0x28] sm:$0xff] %v534_v55 }
 0x151   : > { %v521_v59 = vadd.f32 %v520_v58, %v455_v56 }
 0x153   : > { %v542_v60 = vadd.f32 %v521_v59, %v332_v57  ;;  %v434_v61 = vpop.f32.mrf.mxu0  ;;  %v499_v63 = vpop.f32.mrf.mxu1 }
 0x154   : > { %v500_v0 = vadd.f32 %v499_v63, %v434_v61 }
 0x155   : > { %558 = vst [vmem:[%s1614_s7 + $0x68] sm:$0xff] %v542_v60 }
 0x156   : > { %v535_v1 = vadd.f32 %v500_v0, %v325_v62 }
 0x157   : > { %v458_v2 = vpop.f32.mrf.mxu2 }
 0x158   : > { %v523_v4 = vpop.f32.mrf.mxu3  ;;  %551 = vst [vmem:[%s1614_s7 + $0x30] sm:$0xff] %v535_v1 }
 0x159   : > { %v524_v5 = vadd.f32 %v523_v4, %v458_v2 }
 0x15b   : > { %v543_v6 = vadd.f32 %v524_v5, %v333_v3  ;;  %v437_v7 = vpop.f32.mrf.mxu0  ;;  %v502_v9 = vpop.f32.mrf.mxu1 }
 0x15c   : > { %v503_v10 = vadd.f32 %v502_v9, %v437_v7 }
 0x15d   : > { %559 = vst [vmem:[%s1614_s7 + $0x70] sm:$0xff] %v543_v6 }
 0x15e   : > { %v536_v11 = vadd.f32 %v503_v10, %v326_v8 }
 0x15f   : > { %v461_v12 = vpop.f32.mrf.mxu2 }
 0x160   : > { %v526_v14 = vpop.f32.mrf.mxu3  ;;  %552 = vst [vmem:[%s1614_s7 + $0x38] sm:$0xff] %v536_v11 }
 0x161   : > { %v527_v15 = vadd.f32 %v526_v14, %v461_v12  ;;  %564 = sbr.rel (%p789_p11) target bundleno = 377 (0x179), region = 52 }
 0x163   : > { %v544_v16 = vadd.f32 %v527_v15, %v334_v13 }
 0x165   : > { %560 = vst [vmem:[%s1614_s7 + $0x78] sm:$0xff] %v544_v16 }
 0x166   : > { %v565_v17 = vld [vmem:[%s1614_s7] sm:$0xff]  ;;  %v1016_v18 = vld [vmem:[%s1605_s5] ss:$0 sm:$0xff]  ;;  %v566_v19 = vld [vmem:[%s1614_s7 + $0x8] sm:$0xff] }
 0x167   : > { %v567_v20 = vld [vmem:[%s1614_s7 + $0x10] sm:$0xff]  ;;  %v568_v21 = vld [vmem:[%s1614_s7 + $0x18] sm:$0xff]  ;;  %v585_v22 = vadd.f32 %v1016_v18, %v565_v17  ;;  %v586_v23 = vadd.f32 %v1016_v18, %v566_v19  ;;  %v569_v25 = vld [vmem:[%s1614_s7 + $0x20] sm:$0xff] }
 0x168   : > { %v587_v24 = vadd.f32 %v1016_v18, %v567_v20  ;;  %v570_v26 = vld [vmem:[%s1614_s7 + $0x28] sm:$0xff]  ;;  %v588_v27 = vadd.f32 %v1016_v18, %v568_v21  ;;  %v571_v28 = vld [vmem:[%s1614_s7 + $0x30] sm:$0xff]  ;;  %v589_v29 = vadd.f32 %v1016_v18, %v569_v25  ;;  %v572_v30 = vld [vmem:[%s1614_s7 + $0x38] sm:$0xff] }
 0x169   : > { %601 = vst [vmem:[%s1614_s7] sm:$0xff] %v585_v22  ;;  %v590_v31 = vadd.f32 %v1016_v18, %v570_v26  ;;  %v573_v32 = vld [vmem:[%s1614_s7 + $0x40] sm:$0xff]  ;;  %v591_v33 = vadd.f32 %v1016_v18, %v571_v28  ;;  %v574_v34 = vld [vmem:[%s1614_s7 + $0x48] sm:$0xff]  ;;  %v592_v35 = vadd.f32 %v1016_v18, %v572_v30  ;;  %v575_v36 = vld [vmem:[%s1614_s7 + $0x50] sm:$0xff] }
 0x16a   : > { %602 = vst [vmem:[%s1614_s7 + $0x8] sm:$0xff] %v586_v23  ;;  %v593_v37 = vadd.f32 %v1016_v18, %v573_v32  ;;  %v576_v38 = vld [vmem:[%s1614_s7 + $0x58] sm:$0xff]  ;;  %v594_v39 = vadd.f32 %v1016_v18, %v574_v34  ;;  %v577_v40 = vld [vmem:[%s1614_s7 + $0x60] sm:$0xff]  ;;  %v595_v41 = vadd.f32 %v1016_v18, %v575_v36  ;;  %v578_v42 = vld [vmem:[%s1614_s7 + $0x68] sm:$0xff] }
 0x16b   : > { %603 = vst [vmem:[%s1614_s7 + $0x10] sm:$0xff] %v587_v24  ;;  %v596_v43 = vadd.f32 %v1016_v18, %v576_v38  ;;  %v579_v44 = vld [vmem:[%s1614_s7 + $0x70] sm:$0xff]  ;;  %v597_v45 = vadd.f32 %v1016_v18, %v577_v40  ;;  %v598_v47 = vadd.f32 %v1016_v18, %v578_v42 }
 0x16c   : > { %604 = vst [vmem:[%s1614_s7 + $0x18] sm:$0xff] %v588_v27  ;;  %v580_v46 = vld [vmem:[%s1614_s7 + $0x78] sm:$0xff]  ;;  %v599_v48 = vadd.f32 %v1016_v18, %v579_v44 }
 0x16d   : > { %605 = vst [vmem:[%s1614_s7 + $0x20] sm:$0xff] %v589_v29  ;;  %v600_v49 = vadd.f32 %v1016_v18, %v580_v46 }
 0x16e   : > { %606 = vst [vmem:[%s1614_s7 + $0x28] sm:$0xff] %v590_v31 }
 0x16f   : > { %607 = vst [vmem:[%s1614_s7 + $0x30] sm:$0xff] %v591_v33 }
 0x170   : > { %608 = vst [vmem:[%s1614_s7 + $0x38] sm:$0xff] %v592_v35 }
 0x171   : > { %609 = vst [vmem:[%s1614_s7 + $0x40] sm:$0xff] %v593_v37 }
 0x172   : > { %610 = vst [vmem:[%s1614_s7 + $0x48] sm:$0xff] %v594_v39 }
 0x173   : > { %611 = vst [vmem:[%s1614_s7 + $0x50] sm:$0xff] %v595_v41 }
 0x174   : > { %612 = vst [vmem:[%s1614_s7 + $0x58] sm:$0xff] %v596_v43 }
 0x175   : > { %613 = vst [vmem:[%s1614_s7 + $0x60] sm:$0xff] %v597_v45 }
 0x176   : > { %614 = vst [vmem:[%s1614_s7 + $0x68] sm:$0xff] %v598_v47 }
 0x177   : > { %615 = vst [vmem:[%s1614_s7 + $0x70] sm:$0xff] %v599_v48 }
 0x178   : > { %616 = vst [vmem:[%s1614_s7 + $0x78] sm:$0xff] %v600_v49 }
 0x179 PF: > { %s1905_s18 = sld [smem:[#allocation20_spill]]  ;;  %s632_s2 = sshll.u32 %s1614_s7, 4  ;;  %s633_s2 = int_to_ptr.vmem [resolvable:$true] %s632_s2 }
 0x17a   : > { %s1906_s4 = sld [smem:[#allocation19_spill]]  ;;  %s618_s13 = scalar_lea.sflag [#allocation4], %s292_s9 }
 0x17b   : > { %s1908_s16 = sld [smem:[#allocation30_spill]] }
 0x17f   : > { %s798_s21 = sshll.u32 %s1905_s18, 5 }
 0x180   : > { %s629_s0 = sadd.s32 %s1906_s4, %s798_s21 }
 0x181   : > { %s793_s8 = sshll.u32 %s629_s0, 3  ;;  %s1909_s5 = smov %s1908_s16 }
 0x182   : > { %s631_s26 = scalar_lea.hbm %s1908_s16, %s793_s8  ;;  %s1127_s7 = scalar_lea.hbm %s1909_s5, 512 }
 0x183   : > { %s634_s20 = sshll.u32 %s631_s26, 4  ;;  %s635_s20 = int_to_ptr.hbm [resolvable:$true] %s634_s20 }
 0x184   : > { %s1121_s15 = sshra.s32 %s635_s20, 4  ;;  %s1122_s15 = int_to_ptr.hbm [resolvable:$true] %s1121_s15 }
 0x185   : > { %s1123_s29 = scalar_lea.hbm %s1122_s15, 128  ;;  %p1128_p3 = scmp.lt.s32.totalorder %s1122_s15, %s1909_s5 }
 0x186   : > { %p1124_p10 = scmp.ne.s32.totalorder %s1122_s15, %s1123_s29  ;;  %p1129_p4 = scmp.lt.s32.totalorder %s1127_s7, %s1123_s29 }
 0x188   : > { %p1125_p12 = pnand %p1124_p10, %p1567_p5  ;;  %p1130_p7 = por %p1129_p4, %p1128_p3 }
 0x18a   : > { %p1126_p2 = pneg %p1125_p12 }
 0x18c   : > { %p1131_p13 = pnand %p1130_p7, %p1126_p2 }
 0x18e   : > { %1134 = shalt.err (!%p1131_p13)
}
 0x18f   : > { %s1309_s9 = smov 128   ;;  %s1310_s10 = smov 256  }
 0x190   : > { %s1311_s8 = smov 8  }
 0x191   : > { %837 = dma.vmem_to_hbm [thread:$0]  (%p1567_p5), %s633_s2, 2048, %s635_s20, %s618_s13, %s1309_s9, %s1310_s10, %s1311_s8  }
 0x192 PF: > { %s1910_s24 = sld [smem:[#allocation13_spill]]  ;;  %p854_p9 = scmp.ge.s32.totalorder %s1301_s30, 2 }
 0x194   : > { %p850_p8 = pnand %p854_p9, %p1578_p1 }
 0x196   : > { %p851_p0 = pneg %p850_p8 }
 0x198   : > { %s649_s3 = sand.u32 1, %s1910_s24  }
 0x199   : > { %s650_s16 = scalar_lea.sflag [#allocation4], %s649_s3 }
 0x19a   : > { %1224 = dma.done.wait (%p851_p0), %s650_s16, 2048  }
 0x19b   : > { %1226 = vsyncadd (%p851_p0), %s650_s16, 4294965248  ;;  %s22_s30 = sadd.s32 1, %s1301_s30   ;;  %s1912_s11 = sld [smem:[#allocation14_spill]] }
 0x19c   : > { %p1786_p6 = scmp.ge.s32.totalorder %s22_s30, 10   ;;  %s1913_s15 = sld [smem:[#allocation16_spill]] }
 0x19d   : > { %s1914_s2 = sld [smem:[#allocation17_spill]]  ;;  %s1916_s25 = smov %s1513_s12 }
 0x19e   : > { %s1915_s20 = sld [smem:[#allocation24_spill]]  ;;  %s1921_s13 = smov %s1237_s14 }
 0x19f   : > { %s1917_s26 = sld [smem:[#allocation21_spill]]  ;;  %s1923_s14 = smov %s1516_s1 }
 0x1a0   : > { %s1918_s4 = sld [smem:[#allocation22_spill]]  ;;  %s1925_s16 = smov %s1249_s17 }
 0x1a1   : > { %s1919_s12 = smov %s1912_s11  ;;  %s1920_s7 = sld [smem:[#allocation23_spill]] }
 0x1a2   : > { %s1922_s0 = sld [smem:[#allocation26_spill]]  ;;  %s1926_s17 = smov %s1548_s6 }
 0x1a3   : > { %s1927_s18 = smov %s1257_s19  ;;  %s1928_s19 = smov %s1914_s2 }
 0x1a4   : > { %s1929_s21 = smov %s1269_s22  ;;  %s1930_s22 = smov %s1273_s23 }
 0x1a5   : > { %s1931_s23 = smov %s1916_s25  ;;  %s1932_s24 = smov %s1289_s27 }
 0x1a6   : > { %s1933_s25 = smov %s1293_s28  ;;  %s1934_s27 = smov %s1918_s4 }
 0x1a7   : > { %s1935_s28 = smov %s1920_s7  ;;  %21 = sbr.rel (!%p1786_p6) target bundleno = 20 (0x14), region = 109 }
 0x1a8   : > { %s1936_s29 = smov %s1922_s0 }
 0x1ac   :  { %656 = vsyncpa [#allocation3], 1 }
 0x1ad   :  { %658 = vsyncpa [#allocation3 + $0x1], 1 }
 0x1ae   :  { %659 = vsyncpa [#allocation6], 1 }
 0x1af   :  { %661 = vsyncpa [#allocation6 + $0x1], 1 }
 0x1b0   :  { %662 = vsyncpa [#allocation4], 1 }
 0x1b1   :  { %664 = vsyncpa [#allocation4 + $0x1], 1 }

</bundles_post_ra>
